<compile_context>
chip_gen: v6e
topology: v6e:2x2x1
jax: 0.10.0
libtpu: 0.0.40
codegen_flags: <defaults>
</compile_context>

<pallas_src>
import functools

import jax
import jax.numpy as jnp
from jax.experimental import pallas as pl
from jax.experimental.pallas import tpu as pltpu

HIDDEN_DIM = 256
DEFAULT_BATCH_TILE = 256  # swept per generation: v5e ~128-256, v6e/v7x 256-512
LANE = 128


def _round_up(a: int, b: int) -> int:
    return int(pl.cdiv(a, b)) * b


def _policy_kernel(x_ref, *refs):
    """refs = (w1, b1, w2, b2, ..., wL, bL, out_ref)."""
    o_ref = refs[-1]
    wb = refs[:-1]
    n_layers = len(wb) // 2

    h = x_ref[...]
    for layer in range(n_layers):
        w_ref = wb[2 * layer]
        b_ref = wb[2 * layer + 1]
        # MXU dot in the weights' dtype (bf16 on the fast path), f32 accumulate.
        h = jnp.dot(h.astype(w_ref.dtype), w_ref[...],
                    preferred_element_type=jnp.float32)
        h = h + b_ref[...].astype(jnp.float32)      # f32 epilogue (VPU)
        if layer < n_layers - 1:
            h = jnp.maximum(h, 0.0)                 # ReLU between hidden layers
        else:
            h = jnp.tanh(h)                         # output Tanh (EUP, f32)
    o_ref[...] = h.astype(o_ref.dtype)


def dirac_policy_forward(x, params, *, batch_tile=DEFAULT_BATCH_TILE,
                         use_bf16=True):
    """x: (B, state_dim) f32. params: list of (W(in,out), b(1,out)) per layer."""
    B, state_dim = x.shape
    action_dim = params[-1][0].shape[1]

    # --- pad final layer's output features to a lane-dense multiple of 128 ---
    out_pad = max(LANE, _round_up(action_dim, LANE))
    w_last, b_last = params[-1]
    if out_pad != action_dim:
        w_last = jnp.pad(w_last, ((0, 0), (0, out_pad - action_dim)))
        b_last = jnp.pad(b_last, ((0, 0), (0, out_pad - action_dim)))
    params = list(params[:-1]) + [(w_last, b_last)]

    # --- batch tiling: clamp tile for tiny batches, pad B up to a tile multiple
    tile = min(int(batch_tile), _round_up(B, 8))
    tile = max(8, _round_up(tile, 8))
    B_pad = _round_up(B, tile)
    if B_pad != B:
        x = jnp.pad(x, ((0, B_pad - B), (0, 0)))

    compute_dtype = jnp.bfloat16 if use_bf16 else jnp.float32
    x_in = x.astype(compute_dtype)

    flat_params = []
    in_specs = [pl.BlockSpec((tile, state_dim), lambda i: (i, 0))]
    for (w, b) in params:
        w_c = w.astype(compute_dtype)   # bf16 weights: 2x MXU rate, half the DMA
        b_c = b.astype(jnp.float32)     # biases stay f32 for the f32 epilogue
        flat_params.extend([w_c, b_c])
        in_specs.append(pl.BlockSpec(w_c.shape, lambda i: (0, 0)))
        in_specs.append(pl.BlockSpec(b_c.shape, lambda i: (0, 0)))

    out = pl.pallas_call(
        _policy_kernel,
        out_shape=jax.ShapeDtypeStruct((B_pad, out_pad), jnp.float32),
        grid_spec=pltpu.PrefetchScalarGridSpec(
            num_scalar_prefetch=0,
            grid=(B_pad // tile,),
            in_specs=in_specs,
            out_specs=pl.BlockSpec((tile, out_pad), lambda i: (i, 0)),
        ),
        compiler_params=pltpu.CompilerParams(
            dimension_semantics=("parallel",),     # shards across TCs on v7x
            vmem_limit_bytes=64 * 1024 * 1024,     # headroom for big batch tiles
        ),
    )(x_in, *flat_params)

    return out[:B, :action_dim]


def init_params(key, state_dim, action_dim, layer=2, hidden=HIDDEN_DIM):
    """PyTorch Linear default init U(-1/sqrt(fan_in), 1/sqrt(fan_in)).
    Weights are stored already transposed: (in_features, out_features)."""
    dims = [state_dim] + [hidden] * layer + [action_dim]
    params = []
    for fan_in, fan_out in zip(dims[:-1], dims[1:]):
        key, kw, kb = jax.random.split(key, 3)
        bound = 1.0 / jnp.sqrt(fan_in)
        w = jax.random.uniform(kw, (fan_in, fan_out), jnp.float32, -bound, bound)
        b = jax.random.uniform(kb, (1, fan_out), jnp.float32, -bound, bound)
        params.append((w, b))
    return params


def reference_forward(x, params):
    """Pure-JAX f32 reference (HIGHEST matmul precision)."""
    dot = functools.partial(jnp.dot, precision=jax.lax.Precision.HIGHEST)
    h = x
    for (w, b) in params[:-1]:
        h = jnp.maximum(dot(h, w) + b, 0.0)
    w, b = params[-1]
    return jnp.tanh(dot(h, w) + b)


if __name__ == "__main__":
    # TODO(synk): select_actions()'s .detach().cpu().numpy() is host-side glue,
    # not a kernel op; only forward() is implemented as a Pallas kernel.
    STATE_DIM, ACTION_DIM, LAYER = 17, 6, 2
    key = jax.random.PRNGKey(0)
    key, kx = jax.random.split(key)
    batch = 40  # deliberately not a multiple of the tile -> exercises padding
    x = jax.random.normal(kx, (batch, STATE_DIM), jnp.float32)
    params = init_params(key, STATE_DIM, ACTION_DIM, LAYER)

    ref = reference_forward(x, params)

    # f32 path with a small tile -> multi-step grid + masked final tile rows.
    out_f32 = jax.block_until_ready(
        dirac_policy_forward(x, params, batch_tile=16, use_bf16=False))
    assert out_f32.shape == (batch, ACTION_DIM)
    assert jnp.allclose(out_f32, ref, atol=1e-3, rtol=1e-3), "f32 mismatch"

    # Optimized bf16 path with the default (clamped) batch tile.
    out_bf16 = jax.block_until_ready(
        dirac_policy_forward(x, params, use_bf16=True))
    assert out_bf16.shape == (batch, ACTION_DIM)
    assert jnp.allclose(out_bf16, ref, atol=5e-2, rtol=5e-2), "bf16 mismatch"

    print("KERNEL_OK")
</pallas_src>

<mosaic_0001>
module attributes {stable_mosaic.version = 11 : i64} {
  func.func @_policy_kernel(%arg0: i32, %arg1: memref<16x17xf32, #tpu.memory_space<vmem>>, %arg2: memref<17x256xf32, #tpu.memory_space<vmem>>, %arg3: memref<1x256xf32, #tpu.memory_space<vmem>>, %arg4: memref<256x256xf32, #tpu.memory_space<vmem>>, %arg5: memref<1x256xf32, #tpu.memory_space<vmem>>, %arg6: memref<256x128xf32, #tpu.memory_space<vmem>>, %arg7: memref<1x128xf32, #tpu.memory_space<vmem>>, %arg8: memref<16x128xf32, #tpu.memory_space<vmem>>) attributes {dimension_semantics = [#tpu.dimension_semantics<parallel>], iteration_bounds = array<i64: 3>, scalar_prefetch = 0 : i64, scratch_operands = 0 : i64, tpu.core_type = #tpu.core_type<tc>, window_params = [{transform_indices = @transform_0, window_bounds = array<i64: 16, 17>}, {pipeline_mode = #tpu.pipeline_mode<synchronous>, transform_indices = @transform_1, window_bounds = array<i64: 17, 256>}, {pipeline_mode = #tpu.pipeline_mode<synchronous>, transform_indices = @transform_2, window_bounds = array<i64: 1, 256>}, {pipeline_mode = #tpu.pipeline_mode<synchronous>, transform_indices = @transform_3, window_bounds = array<i64: 256, 256>}, {pipeline_mode = #tpu.pipeline_mode<synchronous>, transform_indices = @transform_4, window_bounds = array<i64: 1, 256>}, {pipeline_mode = #tpu.pipeline_mode<synchronous>, transform_indices = @transform_5, window_bounds = array<i64: 256, 128>}, {pipeline_mode = #tpu.pipeline_mode<synchronous>, transform_indices = @transform_6, window_bounds = array<i64: 1, 128>}, {transform_indices = @transform_7, window_bounds = array<i64: 16, 128>}]} {
    %c0 = arith.constant 0 : index
    %c0_0 = arith.constant 0 : index
    %0 = vector.load %arg1[%c0, %c0_0] : memref<16x17xf32, #tpu.memory_space<vmem>>, vector<16x17xf32>
    %c0_1 = arith.constant 0 : index
    %c0_2 = arith.constant 0 : index
    %1 = vector.load %arg2[%c0_1, %c0_2] : memref<17x256xf32, #tpu.memory_space<vmem>>, vector<17x256xf32>
    %cst = arith.constant dense<0.000000e+00> : vector<16x256xf32>
    %2 = tpu.matmul %0, %1, %cst {dimension_numbers = #tpu.dot_dimension_numbers<[1], [0], [0], [1], [0, 0, 1, 1], [], []>} : vector<16x17xf32>, vector<17x256xf32>, vector<16x256xf32> -> vector<16x256xf32>
    %c0_3 = arith.constant 0 : index
    %c0_4 = arith.constant 0 : index
    %3 = vector.load %arg3[%c0_3, %c0_4] : memref<1x256xf32, #tpu.memory_space<vmem>>, vector<1x256xf32>
    %4 = vector.broadcast %3 : vector<1x256xf32> to vector<16x256xf32>
    %5 = arith.addf %2, %4 : vector<16x256xf32>
    %cst_5 = arith.constant 0.000000e+00 : f32
    %6 = vector.broadcast %cst_5 : f32 to vector<16x256xf32>
    %7 = arith.maximumf %5, %6 : vector<16x256xf32>
    %c0_6 = arith.constant 0 : index
    %c0_7 = arith.constant 0 : index
    %8 = vector.load %arg4[%c0_6, %c0_7] : memref<256x256xf32, #tpu.memory_space<vmem>>, vector<256x256xf32>
    %cst_8 = arith.constant dense<0.000000e+00> : vector<16x256xf32>
    %9 = tpu.matmul %7, %8, %cst_8 {dimension_numbers = #tpu.dot_dimension_numbers<[1], [0], [0], [1], [0, 0, 1, 1], [], []>} : vector<16x256xf32>, vector<256x256xf32>, vector<16x256xf32> -> vector<16x256xf32>
    %c0_9 = arith.constant 0 : index
    %c0_10 = arith.constant 0 : index
    %10 = vector.load %arg5[%c0_9, %c0_10] : memref<1x256xf32, #tpu.memory_space<vmem>>, vector<1x256xf32>
    %11 = vector.broadcast %10 : vector<1x256xf32> to vector<16x256xf32>
    %12 = arith.addf %9, %11 : vector<16x256xf32>
    %cst_11 = arith.constant 0.000000e+00 : f32
    %13 = vector.broadcast %cst_11 : f32 to vector<16x256xf32>
    %14 = arith.maximumf %12, %13 : vector<16x256xf32>
    %c0_12 = arith.constant 0 : index
    %c0_13 = arith.constant 0 : index
    %15 = vector.load %arg6[%c0_12, %c0_13] : memref<256x128xf32, #tpu.memory_space<vmem>>, vector<256x128xf32>
    %cst_14 = arith.constant dense<0.000000e+00> : vector<16x128xf32>
    %16 = tpu.matmul %14, %15, %cst_14 {dimension_numbers = #tpu.dot_dimension_numbers<[1], [0], [0], [1], [0, 0, 1, 1], [], []>} : vector<16x256xf32>, vector<256x128xf32>, vector<16x128xf32> -> vector<16x128xf32>
    %c0_15 = arith.constant 0 : index
    %c0_16 = arith.constant 0 : index
    %17 = vector.load %arg7[%c0_15, %c0_16] : memref<1x128xf32, #tpu.memory_space<vmem>>, vector<1x128xf32>
    %18 = vector.broadcast %17 : vector<1x128xf32> to vector<16x128xf32>
    %19 = arith.addf %16, %18 : vector<16x128xf32>
    %20 = math.tanh %19 : vector<16x128xf32>
    %c0_17 = arith.constant 0 : index
    %c0_18 = arith.constant 0 : index
    %21 = vector.load %arg8[%c0_17, %c0_18] : memref<16x128xf32, #tpu.memory_space<vmem>>, vector<16x128xf32>
    tpu.vector_store %arg8[%c0_17, %c0_18], %20 {strides = array<i32>} : memref<16x128xf32, #tpu.memory_space<vmem>>, vector<16x128xf32>,
    return
  }
  func.func @transform_0(%arg0: i32) -> (i32, i32) {
    %c0_i32 = arith.constant 0 : i32
    %c0_i32_0 = arith.constant 0 : i32
    return %arg0, %c0_i32 : i32, i32
  }
  func.func @transform_1(%arg0: i32) -> (i32, i32) {
    %c0_i32 = arith.constant 0 : i32
    %c0_i32_0 = arith.constant 0 : i32
    %c0_i32_1 = arith.constant 0 : i32
    return %c0_i32, %c0_i32_0 : i32, i32
  }
  func.func @transform_2(%arg0: i32) -> (i32, i32) {
    %c0_i32 = arith.constant 0 : i32
    %c0_i32_0 = arith.constant 0 : i32
    %c0_i32_1 = arith.constant 0 : i32
    return %c0_i32, %c0_i32_0 : i32, i32
  }
  func.func @transform_3(%arg0: i32) -> (i32, i32) {
    %c0_i32 = arith.constant 0 : i32
    %c0_i32_0 = arith.constant 0 : i32
    %c0_i32_1 = arith.constant 0 : i32
    return %c0_i32, %c0_i32_0 : i32, i32
  }
  func.func @transform_4(%arg0: i32) -> (i32, i32) {
    %c0_i32 = arith.constant 0 : i32
    %c0_i32_0 = arith.constant 0 : i32
    %c0_i32_1 = arith.constant 0 : i32
    return %c0_i32, %c0_i32_0 : i32, i32
  }
  func.func @transform_5(%arg0: i32) -> (i32, i32) {
    %c0_i32 = arith.constant 0 : i32
    %c0_i32_0 = arith.constant 0 : i32
    %c0_i32_1 = arith.constant 0 : i32
    return %c0_i32, %c0_i32_0 : i32, i32
  }
  func.func @transform_6(%arg0: i32) -> (i32, i32) {
    %c0_i32 = arith.constant 0 : i32
    %c0_i32_0 = arith.constant 0 : i32
    %c0_i32_1 = arith.constant 0 : i32
    return %c0_i32, %c0_i32_0 : i32, i32
  }
  func.func @transform_7(%arg0: i32) -> (i32, i32) {
    %c0_i32 = arith.constant 0 : i32
    %c0_i32_0 = arith.constant 0 : i32
    return %arg0, %c0_i32 : i32, i32
  }
}

</mosaic_0001>

<bundles_post_ra>
// kernel: tpu_custom_call.1
= control target key start
LH: loop header
LB: loop body
LE: loop exit
PB: predicated region body
PF: predicated region fallthrough
CT: control target
= control target key end

     0   :  { %12 = vsyncpa [#allocation3], 0  ;;  %s1272_s0 = inlined_call_operand.vmem [shape: f32[48,17], index: 0, kind: input, shape index: {}]   ;;  %s1273_s1 = inlined_call_operand.vmem [shape: f32[17,256], index: 1, kind: input, shape index: {}]   ;;  %s1274_s2 = inlined_call_operand.vmem [shape: f32[1,256], index: 2, kind: input, shape index: {}]   ;;  %s1275_s3 = inlined_call_operand.hbm [shape: f32[256,256], index: 3, kind: input, shape index: {}]   ;;  %s1276_s4 = inlined_call_operand.vmem [shape: f32[1,256], index: 4, kind: input, shape index: {}]   ;;  %s1277_s5 = inlined_call_operand.hbm [shape: f32[256,128], index: 5, kind: input, shape index: {}]   ;;  %s1278_s6 = inlined_call_operand.vmem [shape: f32[1,128], index: 6, kind: input, shape index: {}]   ;;  %s1279_s7 = inlined_call_operand.hbm [shape: f32[48,128], index: 7, kind: output, shape index: {}]  }
   0x1   :  { %13 = vsyncpa [#allocation6], 0 }
   0x2   :  { %14 = vsyncpa [#allocation4], 0 }
   0x3   :  { %16 = vsyncpa [#allocation4 + $0x1], 0  ;;  %s1101_s24 = smov 0   ;;  %s1103_s25 = smov 0  }
   0x4   :  { %s1105_s26 = smov 0   ;;  %s1107_s27 = smov 0  }
   0x5 LB: > { %s1122_s28 = sadd.s32 4294967295, %s1049_s27   ;;  %s798_s29 = sadd.s32 4294967294, %s1049_s27   ;;  %s1049_s27 = sphi %s1107_s27, %s1293_s27   ;;  %s1045_s26 = sphi %s1105_s26, %s1292_s26   ;;  %s1041_s25 = sphi %s1103_s25, %s1291_s25   ;;  %s1037_s24 = sphi %s1101_s24, %s1290_s24  }
   0x6   : > { %s1126_s30 = sadd.s32 1, %s1049_s27   ;;  %s181_s8 = sadd.s32 1, %s1045_s26 }
   0x7   : > { %s178_s9 = ssub.s32 %s1049_s27, %s1126_s30  ;;  %p191_p0 = scmp.ne.s32.totalorder %s1045_s26, %s1041_s25 }
   0x8   : > { %p179_p1 = scmp.eq.s32.totalorder %s178_s9, 0  ;;  %p192_p2 = scmp.eq.s32.totalorder %s1122_s28, 2 }
   0x9   : > { %p197_p3 = scmp.ne.s32.totalorder %s1041_s25, %s1037_s24  ;;  %p198_p4 = scmp.eq.s32.totalorder %s798_s29, 2 }
   0xa   : > { %s1137_s10 = scalar_select %p179_p1, %s1045_s26, %s181_s8  }
   0xb   : > { %p1139_p5 = por %p192_p2, %p191_p0  ;;  %p1143_p6 = por %p198_p4, %p197_p3 }
   0xc   : > { %p799_p7 = scmp.ge.s32.totalorder %s1049_s27, 1  ;;  %p205_p8 = scmp.lt.s32.totalorder %s1049_s27, 4 }
   0xd   : > { %s1282_s12 = scalar_select %p1143_p6, 1, 0 }
   0xe   : > { %p1280_p9 = scmp.eq.s32.totalorder %s1122_s28, 0  ;;  %p1150_p10 = pnand %p799_p7, %p205_p8 }
   0xf   : > { %s1051_s14 = smov [#allocation2]   ;;  %s1052_s17 = smov [#allocation5]  }
  0x10   : > { %s223_s15 = sshll.u32 %s1051_s14, 4  ;;  %p868_p11 = pneg %p1150_p10  ;;  %s224_s15 = int_to_ptr.vmem [resolvable:$true] %s223_s15 }
  0x11   : > { %s239_s18 = sshll.u32 %s1052_s17, 4  ;;  %s940_s19 = scalar_lea.vmem %s224_s15, 8192  ;;  %s240_s18 = int_to_ptr.vmem [resolvable:$true] %s239_s18 }
  0x12   : > { %p1158_p12 = pnand %p1280_p9, %p868_p11  ;;  %p941_p0 = scmp.ne.s32.totalorder %s224_s15, %s940_s19 }
  0x13   : > { %p948_p3 = scmp.lt.s32.totalorder %s224_s15, %s224_s15  ;;  %p949_p4 = scmp.lt.s32.totalorder %s940_s19, %s940_s19 }
  0x14   : > { %p931_p13 = pneg %p1158_p12 }
  0x15   : > { %p950_p7 = por %p949_p4, %p948_p3 }
  0x16   : > { %p943_p1 = pnand %p941_p0, %p931_p13 }
  0x18   : > { %p944_p2 = pneg %p943_p1 }
  0x1a   : > { %p951_p8 = pnand %p950_p7, %p944_p2 }
  0x1c   : > { %954 = shalt.err (!%p951_p8)
}
  0x1d   : > { %s1053_s20 = smov 256   ;;  %s1054_s21 = smov 16  }
  0x1e   : > { %871 = dma.hbm_to_vmem [thread:$0]  (!%p1158_p12), %s1275_s3, 8192, %s224_s15, [#allocation3], %s1053_s20, %s1053_s20, %s1054_s21  }
  0x1f   : > { %s966_s29 = scalar_lea.vmem %s240_s18, 4096  ;;  %p974_p9 = scmp.lt.s32.totalorder %s240_s18, %s240_s18 }
  0x20   : > { %p967_p11 = scmp.ne.s32.totalorder %s240_s18, %s966_s29  ;;  %p975_p6 = scmp.lt.s32.totalorder %s966_s29, %s966_s29 }
  0x22   : > { %p969_p0 = pnand %p967_p11, %p931_p13  ;;  %p976_p3 = por %p975_p6, %p974_p9 }
  0x24   : > { %p970_p1 = pneg %p969_p0 }
  0x26   : > { %p977_p2 = pnand %p976_p3, %p970_p1 }
  0x28   : > { %980 = shalt.err (!%p977_p2)
}
  0x29   : > { %s1055_s8 = smov 128   ;;  %s1056_s9 = smov 8  }
  0x2a   : > { %874 = dma.hbm_to_vmem [thread:$0]  (!%p1158_p12), %s1277_s5, 4096, %s240_s18, [#allocation6], %s1055_s8, %s1055_s8, %s1056_s9  }
  0x2b   : > { %267 = sbr.rel (%p1150_p10) target bundleno = 690 (0x2b2), region = 48  ;;  %p1285_p4 = scmp.eq.s32.totalorder (!%p1150_p10), %s1122_s28, 0 }
  0x30   : > { %1024 = dma.done.wait (%p1285_p4), [#allocation3], 8192   ;;  %p1286_p13 = pmov %p1285_p4 }
  0x31   : > { %p1287_p6 = pmov %p1285_p4 }
  0x32   : > { %1026 = vsyncadd (%p1286_p13), [#allocation3], 4294959104 }
  0x33   : > { %1028 = dma.done.wait (%p1287_p6), [#allocation6], 4096   ;;  %p1288_p9 = pmov %p1285_p4 }
  0x34   : > { %s807_s15 = sshll.u32 %s1122_s28, 1  ;;  %v1057_v0 = vmov 0.0   ;;  %vm337_vm0 = vcmask 1040384   ;;  %v317_v1 = vld [vmem:[%s1273_s1 + $0x28] sm:$0x1]  ;;  %v315_v3 = vld [vmem:[%s1273_s1 + $0x18] sm:$0xff] }
  0x35   : > { %1030 = vsyncadd (%p1288_p9), [#allocation6], 4294963200  ;;  %408 = vmatprep.mubr.f32.mxu0 %v1057_v0  ;;  %p304_p12 = scmp.lt.s32.totalorder %s807_s15, 5  ;;  %v316_v2 = vld [vmem:[%s1273_s1 + $0x20] sm:$0x1]  ;;  %809 = vmatprep.subr.msk.mxu0 %vm337_vm0, %v317_v1  ;;  %v314_v4 = vld [vmem:[%s1273_s1 + $0x10] sm:$0xff] }
  0x36   : > { %810 = vmatpush1.msk.msra.mxu0 %vm337_vm0, %v316_v2  ;;  %v313_v5 = vld [vmem:[%s1273_s1 + $0x8] sm:$0xff]  ;;  %v312_v6 = vld [vmem:[%s1273_s1] sm:$0xff]  ;;  %v456_v7 = vld [vmem:[#allocation2 + $0xf8] sm:$0xff]  ;;  %vm330_vm1 = vcmask 138240   ;;  %s300_s29 = sand.u32 1, %s1041_s25   ;;  %s819_s9 = sshll.u32 %s1122_s28, 8 }
  0x37   : > { %s1295_s15 = smov (!%p304_p12, %s807_s15), 5  ;;  %372 = vmatprep.subr.mxu0 %v315_v3  ;;  %501 = vmatprep.subr.mxu1 %v456_v7  ;;  %v455_v8 = vld [vmem:[#allocation2 + $0xf0] sm:$0xff]  ;;  %v454_v9 = vld [vmem:[#allocation2 + $0xe8] sm:$0xff]  ;;  %v453_v10 = vld [vmem:[#allocation2 + $0xe0] sm:$0xff]  ;;  %s806_s8 = sshll.u32 %s300_s29, 4 }
  0x38   : > { %s808_s13 = sshll.u32 %s1295_s15, 3  ;;  %373 = vmatpush1.msra.mxu0 %v314_v4  ;;  %502 = vmatpush1.msra.mxu1 %v455_v8  ;;  %v452_v12 = vld [vmem:[#allocation2 + $0xd8] sm:$0xff]  ;;  %v451_v13 = vld [vmem:[#allocation2 + $0xd0] sm:$0xff]  ;;  %v450_v14 = vld [vmem:[#allocation2 + $0xc8] sm:$0xff]  ;;  %s1228_s18 = scalar_lea.hbm %s1279_s7, %s819_s9 }
  0x39   : > { %s307_s14 = scalar_lea.vmem %s1272_s0, %s808_s13  ;;  %374 = vmatprep.subr.mxu0 %v313_v5  ;;  %503 = vmatprep.subr.mxu1 %v454_v9  ;;  %v449_v15 = vld [vmem:[#allocation2 + $0xc0] sm:$0xff]  ;;  %v448_v17 = vld [vmem:[#allocation2 + $0xb8] sm:$0xff]  ;;  %v447_v18 = vld [vmem:[#allocation2 + $0xb0] sm:$0xff]  ;;  %s1232_s13 = scalar_lea.sflag [#allocation4], %s300_s29 }
  0x3a   : > { %v310_v11 = vld [vmem:[%s307_s14] sm:$0xff]  ;;  %375 = vmatpush1.msra.mxu0 %v312_v6  ;;  %504 = vmatpush1.msra.mxu1 %v453_v10  ;;  %v311_v16 = vld [vmem:[%s307_s14 + $0x8] sm:$0xff]  ;;  %v444_v21 = vld [vmem:[#allocation2 + $0x98] sm:$0xff]  ;;  %s302_s14 = scalar_lea.vmem [#allocation7], %s806_s8  ;;  %s1058_s28 = smov [#allocation7]  }
  0x3b   : > { %811 = vmatmul.mubr.msk.f32.vlgmr.msra.gmra.mxu0 %vm330_vm1, %v310_v11  ;;  %505 = vmatprep.subr.mxu1 %v452_v12  ;;  %v446_v19 = vld [vmem:[#allocation2 + $0xa8] sm:$0xff]  ;;  %v445_v20 = vld [vmem:[#allocation2 + $0xa0] sm:$0xff]  ;;  %v443_v22 = vld [vmem:[#allocation2 + $0x90] sm:$0xff]  ;;  %s714_s17 = sshll.u32 %s302_s14, 4  ;;  %s985_s20 = sshll.u32 %s1058_s28, 4  ;;  %s1230_s17 = int_to_ptr.vmem [resolvable:$true] %s714_s17  ;;  %s986_s20 = int_to_ptr.vmem [resolvable:$false] %s985_s20 }
  0x3c   : > { %414 = vmatprep.mubr.f32.mxu0 %v1057_v0  ;;  %506 = vmatpush1.msra.mxu1 %v451_v13  ;;  %v442_v23 = vld [vmem:[#allocation2 + $0x88] sm:$0xff]  ;;  %v441_v24 = vld [vmem:[#allocation2 + $0x80] sm:$0xff]  ;;  %v440_v25 = vld [vmem:[#allocation2 + $0x78] sm:$0xff]  ;;  %s981_s19 = scalar_lea.vmem %s1230_s17, 256  ;;  %s987_s21 = scalar_lea.vmem %s986_s20, 512 }
  0x3d   : > { %507 = vmatprep.subr.mxu1 %v450_v14  ;;  %v439_v26 = vld [vmem:[#allocation2 + $0x70] sm:$0xff]  ;;  %v438_v27 = vld [vmem:[#allocation2 + $0x68] sm:$0xff]  ;;  %v437_v28 = vld [vmem:[#allocation2 + $0x60] sm:$0xff]  ;;  %p982_p10 = scmp.ne.s32.totalorder %s1230_s17, %s981_s19  ;;  %p988_p11 = scmp.lt.s32.totalorder %s1230_s17, %s986_s20 }
  0x3e   : > { %508 = vmatpush1.msra.mxu1 %v449_v15  ;;  %v436_v29 = vld [vmem:[#allocation2 + $0x58] sm:$0xff]  ;;  %v435_v30 = vld [vmem:[#allocation2 + $0x50] sm:$0xff]  ;;  %v434_v31 = vld [vmem:[#allocation2 + $0x48] sm:$0xff]  ;;  %p989_p0 = scmp.lt.s32.totalorder %s987_s21, %s981_s19 }
  0x3f   : > { %812 = vmatmul.mubr.msk.f32.gmra.mxu0 %vm330_vm1, %v311_v16  ;;  %509 = vmatprep.subr.mxu1 %v448_v17  ;;  %v433_v32 = vld [vmem:[#allocation2 + $0x40] sm:$0xff]  ;;  %v432_v33 = vld [vmem:[#allocation2 + $0x38] sm:$0xff]  ;;  %v431_v34 = vld [vmem:[#allocation2 + $0x30] sm:$0xff]  ;;  %p983_p7 = pnand %p982_p10, %p1139_p5 }
  0x40   : > { %510 = vmatpush1.msra.mxu1 %v447_v18  ;;  %v430_v35 = vld [vmem:[#allocation2 + $0x28] sm:$0xff]  ;;  %v429_v36 = vld [vmem:[#allocation2 + $0x20] sm:$0xff]  ;;  %v428_v37 = vld [vmem:[#allocation2 + $0x18] sm:$0xff]  ;;  %p990_p1 = por %p989_p0, %p988_p11 }
  0x41   : > { %511 = vmatprep.subr.mxu1 %v446_v19  ;;  %v427_v38 = vld [vmem:[#allocation2 + $0x10] sm:$0xff]  ;;  %v426_v39 = vld [vmem:[#allocation2 + $0x8] sm:$0xff]  ;;  %v425_v40 = vld [vmem:[#allocation2] sm:$0xff]  ;;  %p984_p8 = pneg %p983_p7 }
  0x42   : > { %512 = vmatpush1.msra.mxu1 %v445_v20  ;;  %v488_v41 = vld [vmem:[#allocation2 + $0x1f8] sm:$0xff]  ;;  %v487_v42 = vld [vmem:[#allocation2 + $0x1f0] sm:$0xff]  ;;  %v486_v43 = vld [vmem:[#allocation2 + $0x1e8] sm:$0xff] }
  0x43   : > { %513 = vmatprep.subr.mxu1 %v444_v21  ;;  %v485_v44 = vld [vmem:[#allocation2 + $0x1e0] sm:$0xff]  ;;  %v484_v45 = vld [vmem:[#allocation2 + $0x1d8] sm:$0xff]  ;;  %v483_v46 = vld [vmem:[#allocation2 + $0x1d0] sm:$0xff]  ;;  %p991_p3 = pnand %p990_p1, %p984_p8 }
  0x44   : > { %514 = vmatpush1.msra.mxu1 %v443_v22  ;;  %v482_v47 = vld [vmem:[#allocation2 + $0x1c8] sm:$0xff]  ;;  %v481_v48 = vld [vmem:[#allocation2 + $0x1c0] sm:$0xff]  ;;  %v480_v49 = vld [vmem:[#allocation2 + $0x1b8] sm:$0xff] }
  0x45   : > { %515 = vmatprep.subr.mxu1 %v442_v23  ;;  %v479_v50 = vld [vmem:[#allocation2 + $0x1b0] sm:$0xff]  ;;  %v478_v51 = vld [vmem:[#allocation2 + $0x1a8] sm:$0xff]  ;;  %v477_v52 = vld [vmem:[#allocation2 + $0x1a0] sm:$0xff] }
  0x46   : > { %516 = vmatpush1.msra.mxu1 %v441_v24  ;;  %v476_v53 = vld [vmem:[#allocation2 + $0x198] sm:$0xff]  ;;  %v475_v54 = vld [vmem:[#allocation2 + $0x190] sm:$0xff]  ;;  %v474_v55 = vld [vmem:[#allocation2 + $0x188] sm:$0xff] }
  0x47   : > { %517 = vmatprep.subr.mxu1 %v440_v25  ;;  %v473_v56 = vld [vmem:[#allocation2 + $0x180] sm:$0xff]  ;;  %v472_v57 = vld [vmem:[#allocation2 + $0x178] sm:$0xff]  ;;  %v471_v58 = vld [vmem:[#allocation2 + $0x170] sm:$0xff] }
  0x48   : > { %518 = vmatpush1.msra.mxu1 %v439_v26  ;;  %v470_v59 = vld [vmem:[#allocation2 + $0x168] sm:$0xff]  ;;  %v469_v60 = vld [vmem:[#allocation2 + $0x160] sm:$0xff]  ;;  %v468_v61 = vld [vmem:[#allocation2 + $0x158] sm:$0xff] }
  0x49   : > { %519 = vmatprep.subr.mxu1 %v438_v27  ;;  %v467_v62 = vld [vmem:[#allocation2 + $0x150] sm:$0xff]  ;;  %v466_v63 = vld [vmem:[#allocation2 + $0x148] sm:$0xff]  ;;  %v465_v0 = vld [vmem:[#allocation2 + $0x140] sm:$0xff] }
  0x4a   : > { %520 = vmatpush1.msra.mxu1 %v437_v28  ;;  %v464_v1 = vld [vmem:[#allocation2 + $0x138] sm:$0xff]  ;;  %v463_v2 = vld [vmem:[#allocation2 + $0x130] sm:$0xff]  ;;  %v462_v3 = vld [vmem:[#allocation2 + $0x128] sm:$0xff] }
  0x4b   : > { %521 = vmatprep.subr.mxu1 %v436_v29  ;;  %v461_v4 = vld [vmem:[#allocation2 + $0x120] sm:$0xff]  ;;  %v460_v5 = vld [vmem:[#allocation2 + $0x118] sm:$0xff]  ;;  %v459_v6 = vld [vmem:[#allocation2 + $0x110] sm:$0xff] }
  0x4c   : > { %522 = vmatpush1.msra.mxu1 %v435_v30  ;;  %v458_v7 = vld [vmem:[#allocation2 + $0x108] sm:$0xff]  ;;  %v457_v8 = vld [vmem:[#allocation2 + $0x100] sm:$0xff]  ;;  %v613_v9 = vld [vmem:[#allocation5 + $0xf8] sm:$0xff] }
  0x4d   : > { %523 = vmatprep.subr.mxu1 %v434_v31  ;;  %v597_v10 = vld [vmem:[#allocation5 + $0x78] sm:$0xff]  ;;  %v612_v11 = vld [vmem:[#allocation5 + $0xf0] sm:$0xff]  ;;  %820 = vmatprep.subr.mxu0 %v613_v9  ;;  %v611_v13 = vld [vmem:[#allocation5 + $0xe8] sm:$0xff] }
  0x4e   : > { %524 = vmatpush1.msra.mxu1 %v433_v32  ;;  %v596_v12 = vld [vmem:[#allocation5 + $0x70] sm:$0xff]  ;;  %821 = vmatpush3.msra.mxu0 %v597_v10  ;;  %v595_v14 = vld [vmem:[#allocation5 + $0x68] sm:$0xff]  ;;  %v610_v15 = vld [vmem:[#allocation5 + $0xe0] sm:$0xff] }
  0x4f   : > { %525 = vmatprep.subr.mxu1 %v432_v33  ;;  %822 = vmatprep.subr.mxu0 %v612_v11  ;;  %v594_v16 = vld [vmem:[#allocation5 + $0x60] sm:$0xff]  ;;  %v609_v17 = vld [vmem:[#allocation5 + $0xd8] sm:$0xff]  ;;  %v608_v19 = vld [vmem:[#allocation5 + $0xd0] sm:$0xff]  ;;  %v320_v33 = vlaneseq }
  0x50   : > { %526 = vmatpush1.msra.mxu1 %v431_v34  ;;  %823 = vmatpush3.msra.mxu0 %v596_v12  ;;  %v593_v18 = vld [vmem:[#allocation5 + $0x58] sm:$0xff]  ;;  %v592_v20 = vld [vmem:[#allocation5 + $0x50] sm:$0xff]  ;;  %v607_v21 = vld [vmem:[#allocation5 + $0xc8] sm:$0xff] }
  0x51   : > { %527 = vmatprep.subr.mxu1 %v430_v35  ;;  %824 = vmatprep.subr.mxu0 %v611_v13  ;;  %v591_v22 = vld [vmem:[#allocation5 + $0x48] sm:$0xff]  ;;  %v606_v23 = vld [vmem:[#allocation5 + $0xc0] sm:$0xff]  ;;  %v605_v25 = vld [vmem:[#allocation5 + $0xb8] sm:$0xff]  ;;  %v321_v34 = vshrl.u32 %v320_v33, 7 }
  0x52   : > { %528 = vmatpush1.msra.mxu1 %v429_v36  ;;  %825 = vmatpush3.msra.mxu0 %v595_v14  ;;  %v590_v24 = vld [vmem:[#allocation5 + $0x40] sm:$0xff]  ;;  %v589_v26 = vld [vmem:[#allocation5 + $0x38] sm:$0xff]  ;;  %v604_v27 = vld [vmem:[#allocation5 + $0xb0] sm:$0xff] }
  0x53   : > { %529 = vmatprep.subr.mxu1 %v428_v37  ;;  %826 = vmatprep.subr.mxu0 %v610_v15  ;;  %v588_v28 = vld [vmem:[#allocation5 + $0x30] sm:$0xff]  ;;  %v603_v29 = vld [vmem:[#allocation5 + $0xa8] sm:$0xff]  ;;  %v602_v31 = vld [vmem:[#allocation5 + $0xa0] sm:$0xff]  ;;  %v322_v35 = vsub.s32 0, %v321_v34  ;;  %v326_v37 = vsub.s32 1, %v321_v34 }
  0x54   : > { %530 = vmatpush1.msra.mxu1 %v427_v38  ;;  %827 = vmatpush3.msra.mxu0 %v594_v16  ;;  %v587_v30 = vld [vmem:[#allocation5 + $0x28] sm:$0xff]  ;;  %v586_v32 = vld [vmem:[#allocation5 + $0x20] sm:$0xff] }
  0x55   : > { %531 = vmatprep.subr.mxu1 %v426_v39  ;;  %828 = vmatprep.subr.mxu0 %v609_v17  ;;  %v318_v36 = vld [vmem:[%s1274_s2] sm:$0x3] }
  0x56   : > { %532 = vmatpush1.msra.mxu1 %v425_v40  ;;  %829 = vmatpush3.msra.mxu0 %v593_v18  ;;  %v323_v38 = vrot.slane %v318_v36, %v322_v35  ;;  %v327_v39 = vrot.slane %v318_v36, %v326_v37  ;;  %v813_v12 = vld [vmem:[%s1278_s6] ss:$0 sm:$0xff] }
  0x57   : > { %533 = vmatprep.subr.mxu1 %v488_v41  ;;  %830 = vmatprep.subr.mxu0 %v608_v19 }
  0x58   : > { %534 = vmatpush2.msra.mxu1 %v487_v42  ;;  %831 = vmatpush3.msra.mxu0 %v592_v20 }
  0x59   : > { %535 = vmatprep.subr.mxu1 %v486_v43  ;;  %832 = vmatprep.subr.mxu0 %v607_v21 }
  0x5a   : > { %536 = vmatpush2.msra.mxu1 %v485_v44  ;;  %833 = vmatpush3.msra.mxu0 %v591_v22 }
  0x5b   : > { %537 = vmatprep.subr.mxu1 %v484_v45  ;;  %834 = vmatprep.subr.mxu0 %v606_v23 }
  0x5c   : > { %538 = vmatpush2.msra.mxu1 %v483_v46  ;;  %835 = vmatpush3.msra.mxu0 %v590_v24 }
  0x5d   : > { %539 = vmatprep.subr.mxu1 %v482_v47  ;;  %836 = vmatprep.subr.mxu0 %v605_v25 }
  0x5e   : > { %540 = vmatpush2.msra.mxu1 %v481_v48  ;;  %837 = vmatpush3.msra.mxu0 %v589_v26 }
  0x5f   : > { %541 = vmatprep.subr.mxu1 %v480_v49  ;;  %838 = vmatprep.subr.mxu0 %v604_v27 }
  0x60   : > { %542 = vmatpush2.msra.mxu1 %v479_v50  ;;  %839 = vmatpush3.msra.mxu0 %v588_v28 }
  0x61   : > { %543 = vmatprep.subr.mxu1 %v478_v51  ;;  %840 = vmatprep.subr.mxu0 %v603_v29 }
  0x62   : > { %544 = vmatpush2.msra.mxu1 %v477_v52  ;;  %841 = vmatpush3.msra.mxu0 %v587_v30  ;;  %v601_v52 = vld [vmem:[#allocation5 + $0x98] sm:$0xff] }
  0x63   : > { %545 = vmatprep.subr.mxu1 %v476_v53  ;;  %842 = vmatprep.subr.mxu0 %v602_v31  ;;  %v585_v53 = vld [vmem:[#allocation5 + $0x18] sm:$0xff] }
  0x64   : > { %546 = vmatpush2.msra.mxu1 %v475_v54  ;;  %843 = vmatpush3.msra.mxu0 %v586_v32  ;;  %v600_v54 = vld [vmem:[#allocation5 + $0x90] sm:$0xff] }
  0x65   : > { %547 = vmatprep.subr.mxu1 %v474_v55  ;;  %844 = vmatprep.subr.mxu0 %v601_v52  ;;  %v584_v55 = vld [vmem:[#allocation5 + $0x10] sm:$0xff] }
  0x66   : > { %548 = vmatpush2.msra.mxu1 %v473_v56  ;;  %845 = vmatpush3.msra.mxu0 %v585_v53  ;;  %v599_v56 = vld [vmem:[#allocation5 + $0x88] sm:$0xff] }
  0x67   : > { %549 = vmatprep.subr.mxu1 %v472_v57  ;;  %846 = vmatprep.subr.mxu0 %v600_v54  ;;  %v583_v57 = vld [vmem:[#allocation5 + $0x8] sm:$0xff] }
  0x68   : > { %550 = vmatpush2.msra.mxu1 %v471_v58  ;;  %847 = vmatpush3.msra.mxu0 %v584_v55  ;;  %v598_v58 = vld [vmem:[#allocation5 + $0x80] sm:$0xff] }
  0x69   : > { %551 = vmatprep.subr.mxu1 %v470_v59  ;;  %848 = vmatprep.subr.mxu0 %v599_v56  ;;  %v582_v59 = vld [vmem:[#allocation5] sm:$0xff] }
  0x6a   : > { %552 = vmatpush2.msra.mxu1 %v469_v60  ;;  %849 = vmatpush3.msra.mxu0 %v583_v57  ;;  %v489_v60 = vld [vmem:[%s1276_s4] sm:$0x3] }
  0x6b   : > { %553 = vmatprep.subr.mxu1 %v468_v61  ;;  %850 = vmatprep.subr.mxu0 %v598_v58  ;;  %v494_v61 = vrot.slane %v489_v60, %v322_v35 }
  0x6c   : > { %554 = vmatpush2.msra.mxu1 %v467_v62  ;;  %851 = vmatpush3.msra.mxu0 %v582_v59  ;;  %v498_v62 = vrot.slane %v489_v60, %v326_v37 }
  0x6d   : > { %555 = vmatprep.subr.mxu1 %v466_v63 }
  0x6e   : > { %556 = vmatpush2.msra.mxu1 %v465_v0 }
  0x6f   : > { %557 = vmatprep.subr.mxu1 %v464_v1 }
  0x70   : > { %558 = vmatpush2.msra.mxu1 %v463_v2 }
  0x71   : > { %559 = vmatprep.subr.mxu1 %v462_v3 }
  0x72   : > { %560 = vmatpush2.msra.mxu1 %v461_v4 }
  0x73   : > { %561 = vmatprep.subr.mxu1 %v460_v5 }
  0x74   : > { %562 = vmatpush2.msra.mxu1 %v459_v6 }
  0x75   : > { %563 = vmatprep.subr.mxu1 %v458_v7 }
  0x76   : > { %564 = vmatpush2.msra.mxu1 %v457_v8 }
  0xfb   : > { %v410_v40 = vpop.f32.mrf.mxu0 }
  0xfc   : > { %v411_v41 = vadd.f32 %v410_v40, %v323_v38 }
  0xfd   : > { %v412_v42 = vpop.f32.mrf.mxu0 }
  0xfe   : > { %v413_v43 = vadd.f32 %v412_v42, %v327_v39  ;;  %v421_v46 = vmax.f32 %v411_v41, 0.0 }
  0xff   : > { %v416_v44 = vpop.f32.mrf.mxu0 }
 0x100   : > { %v422_v45 = vmax.f32 %v413_v43, 0.0  ;;  %v417_v47 = vadd.f32 %v416_v44, %v323_v38 }
 0x101   : > { %v418_v48 = vpop.f32.mrf.mxu0 }
 0x102   : > { %v419_v49 = vadd.f32 %v418_v48, %v327_v39  ;;  %565 = vmatprep.mubr.f32.mxu1 %v422_v45  ;;  %v423_v51 = vmax.f32 %v417_v47, 0.0 }
 0x103   : > { %566 = vmatmul.mubr.f32.vlgmr.msra.gmra.mxu1 %v421_v46 }
 0x104   : > { %v424_v50 = vmax.f32 %v419_v49, 0.0 }
 0x106   : > { %571 = vmatprep.mubr.f32.mxu1 %v424_v50 }
 0x107   : > { %572 = vmatmul.mubr.f32.gmra.mxu1 %v423_v51 }
 0x1c3   : > { %v567_v63 = vpop.f32.mrf.mxu1 }
 0x1c4   : > { %v568_v0 = vadd.f32 %v567_v63, %v494_v61 }
 0x1c5   : > { %v569_v1 = vpop.f32.mrf.mxu1 }
 0x1c6   : > { %v570_v2 = vadd.f32 %v569_v1, %v498_v62  ;;  %v578_v5 = vmax.f32 %v568_v0, 0.0 }
 0x1c7   : > { %v573_v3 = vpop.f32.mrf.mxu1 }
 0x1c8   : > { %v579_v4 = vmax.f32 %v570_v2, 0.0  ;;  %v574_v6 = vadd.f32 %v573_v3, %v494_v61 }
 0x1c9   : > { %v575_v7 = vpop.f32.mrf.mxu1 }
 0x1ca   : > { %v576_v8 = vadd.f32 %v575_v7, %v498_v62  ;;  %685 = vmatprep.mubr.f32.mxu0 %v579_v4  ;;  %v580_v10 = vmax.f32 %v574_v6, 0.0 }
 0x1cb   : > { %686 = vmatmul.mubr.f32.vlgmr.msra.gmra.mxu0 %v578_v5 }
 0x1cc   : > { %v581_v9 = vmax.f32 %v576_v8, 0.0 }
 0x1ce   : > { %690 = vmatprep.mubr.f32.mxu0 %v581_v9 }
 0x1cf   : > { %691 = vmatmul.mubr.f32.gmra.mxu0 %v580_v10 }
 0x28b   : > { %v852_v11 = vpop.f32.mrf.mxu0 }
 0x28d   : > { %v853_v13 = vpop.f32.mrf.mxu0 }
 0x28e   : > { %v854_v14 = vadd.f32 %v853_v13, %v852_v11 }
 0x28f   : > { %v855_v15 = vpop.f32.mrf.mxu0 }
 0x290   : > { %v688_v16 = vadd.f32 %v854_v14, %v813_v12 }
 0x291   : > { %v856_v17 = vpop.f32.mrf.mxu0 }
 0x292   : > { %925 = vtanh.f32 %v688_v16  ;;  %v857_v18 = vadd.f32 %v856_v17, %v855_v15 }
 0x294   : > { %v693_v19 = vadd.f32 %v857_v18, %v813_v12 }
 0x296   : > { %927 = vtanh.f32 %v693_v19 }
 0x29f   : > { %v926_v20 = vpop.eup %925 }
 0x2a0   : > { %698 = vst [vmem:[%s302_s14] sm:$0xff] %v926_v20 }
 0x2a3   : > { %v928_v21 = vpop.eup %927 }
 0x2a4   : > { %699 = vst [vmem:[%s302_s14 + $0x8] sm:$0xff] %v928_v21 }
 0x2a5   : > { %994 = shalt.err (!%p991_p3)
}
 0x2a6   : > { %s995_s22 = scalar_lea.hbm %s1228_s18, 256  ;;  %s999_s8 = scalar_lea.hbm %s1279_s7, 768 }
 0x2a7   : > { %p996_p2 = scmp.ne.s32.totalorder %s1228_s18, %s995_s22  ;;  %p1000_p6 = scmp.lt.s32.totalorder %s1228_s18, %s1279_s7 }
 0x2a8   : > { %p1001_p9 = scmp.lt.s32.totalorder %s999_s8, %s995_s22 }
 0x2a9   : > { %p997_p4 = pnand %p996_p2, %p1139_p5 }
 0x2aa   : > { %p1002_p12 = por %p1001_p9, %p1000_p6 }
 0x2ab   : > { %p998_p13 = pneg %p997_p4 }
 0x2ad   : > { %p1003_p10 = pnand %p1002_p12, %p998_p13 }
 0x2af   : > { %1006 = shalt.err (!%p1003_p10)
}
 0x2b0   : > { %s1059_s15 = smov 128   ;;  %s1060_s16 = smov 8  }
 0x2b1   : > { %866 = dma.vmem_to_hbm [thread:$0]  (%p1139_p5), %s1230_s17, 256, %s1228_s18, %s1232_s13, %s1059_s15, %s1059_s15, %s1060_s16  }
 0x2b2 PF: > { %p883_p7 = scmp.ge.s32.totalorder %s1049_s27, 2  ;;  %s729_s19 = sand.u32 1, %s1037_s24  }
 0x2b3   : > { %p1289_p8 = scmp.ne.s32.totalorder %s1282_s12, 0  ;;  %s730_s28 = scalar_lea.sflag [#allocation4], %s729_s19 }
 0x2b5   : > { %p876_p11 = pnand %p883_p7, %p1289_p8 }
 0x2b7   : > { %p877_p0 = pneg %p876_p11 }
 0x2b9   : > { %1032 = dma.done.wait (%p877_p0), %s730_s28, 256  }
 0x2ba   : > { %1034 = vsyncadd (%p877_p0), %s730_s28, 4294967040  ;;  %p19_p1 = scmp.ge.s32.totalorder %s1126_s30, 5   ;;  %s1290_s24 = smov %s1041_s25 }
 0x2bb   : > { %s1291_s25 = smov %s1045_s26  ;;  %s1292_s26 = smov %s1137_s10 }
 0x2bc   : > { %s1293_s27 = smov %s1126_s30  ;;  %21 = sbr.rel (!%p19_p1) target bundleno = 5 (0x5), region = 92 }
 0x2c1   :  { %735 = vsyncpa [#allocation3], 1 }
 0x2c2   :  { %737 = vsyncpa [#allocation3 + $0x1], 1 }
 0x2c3   :  { %738 = vsyncpa [#allocation6], 1 }
 0x2c4   :  { %739 = vsyncpa [#allocation4], 1 }
 0x2c5   :  { %741 = vsyncpa [#allocation4 + $0x1], 1 }

</bundles_post_ra>
